<compile_context>
chip_gen: v7x
topology: tpu7x:2x2x1
jax: 0.10.0
libtpu: 0.0.40
codegen_flags: <defaults>
</compile_context>

<pallas_src>
import functools

import jax
import jax.numpy as jnp
from jax import lax
from jax.experimental import pallas as pl
from jax.experimental.pallas import tpu as pltpu


def _round_up(n, m):
    return ((n + m - 1) // m) * m


def mlp_kernel(x_ref, w1_ref, b1_ref, w2_ref, b2_ref, w3_ref, b3_ref, o_ref,
               *, chunk):
    # Weights/biases are tiny, VMEM-resident across grid steps.
    w1 = w1_ref[...]            # (32, 1)
    b1 = b1_ref[...]            # (32, 1)
    w2 = w2_ref[...]            # (32, 32)
    b2 = b2_ref[...]            # (32, 1)
    w3 = w3_ref[...]            # (1, 32)
    b3 = b3_ref[0, 0]           # scalar in SMEM

    tile = x_ref.shape[-1]
    n_chunks = tile // chunk    # chunk divides tile by construction

    def body(c, carry):
        start = pl.multiple_of(c * chunk, chunk)
        x = x_ref[:, pl.ds(start, chunk)]                              # (1, C)

        # fc1: in_features = 1 -> degenerate K=1 matmul; broadcast
        # multiply-add on the VPU instead of an MXU pass.
        h1 = jnp.maximum(w1 * x + b1, 0.0)                             # (32, C)

        # fc2: 32x32 matmul on the MXU, f32 accumulation; bias + ReLU on VPU.
        h2 = jnp.dot(w2, h1, preferred_element_type=jnp.float32) + b2
        h2 = jnp.maximum(h2, 0.0)                                      # (32, C)

        # fc3: (1,32)@(32,C) on the otherwise-idle MXU; only +b3 on the VPU.
        y = jnp.dot(w3, h2, preferred_element_type=jnp.float32) + b3   # (1, C)

        o_ref[:, pl.ds(start, chunk)] = y.astype(o_ref.dtype)
        return carry

    lax.fori_loop(0, n_chunks, body, None)


def net_forward(x, params, tile_n=32768):
    """x: (N, 1) float32. Returns (N, 1) float32.

    Params layout (torch (out, in) orientation):
      w1: (32, 1)  b1: (32, 1)
      w2: (32, 32) b2: (32, 1)
      w3: (1, 32)  b3: (1, 1)
    """
    w1, b1, w2, b2, w3, b3 = (params[k] for k in ("w1", "b1", "w2", "b2", "w3", "b3"))
    n = x.shape[0]

    # Feature-major: batch on the lane axis.
    xt = x.reshape(1, n)

    # Lane-dense batch tile: large enough to amortize per-step pipeline
    # overhead, small enough that double-buffered I/O blocks + per-chunk
    # intermediates stay far below VMEM limits on all generations.
    n128 = _round_up(n, 128)
    tile = min(tile_n, n128)
    # Keep the grid at >= 2 steps when the batch allows, so the "parallel"
    # batch axis can actually be sharded across the two TensorCores on v7x.
    if tile == n128 and n128 >= 256:
        tile = _round_up((n128 + 1) // 2, 128)
    n_pad = _round_up(n, tile)
    if n_pad != n:
        xt = jnp.pad(xt, ((0, 0), (0, n_pad - n)))
    grid = (n_pad // tile,)

    # In-kernel sub-chunk (multiple of 128 lanes that divides the tile):
    # keeps h1/h2 at ~16 vregs each instead of (32, tile) VMEM temporaries.
    chunk = next(c for c in (512, 256, 128) if tile % c == 0)

    # Full-array VMEM blocks with constant index maps -> DMA'd once, resident.
    resident = lambda shape: pl.BlockSpec(shape, lambda i: (0,) * len(shape))

    out = pl.pallas_call(
        functools.partial(mlp_kernel, chunk=chunk),
        out_shape=jax.ShapeDtypeStruct((1, n_pad), jnp.float32),
        grid=grid,
        in_specs=[
            pl.BlockSpec((1, tile), lambda i: (0, i)),                  # x tile
            resident(w1.shape), resident(b1.shape),
            resident(w2.shape), resident(b2.shape),
            resident(w3.shape),
            pl.BlockSpec(memory_space=pltpu.MemorySpace.SMEM),          # b3 scalar
        ],
        out_specs=pl.BlockSpec((1, tile), lambda i: (0, i)),            # lane-dense
        compiler_params=pltpu.CompilerParams(
            dimension_semantics=("parallel",),
            vmem_limit_bytes=48 * 1024 * 1024,
        ),
    )(xt, w1, b1, w2, b2, w3, b3)

    return out[:, :n].reshape(n, 1)


def init_params(key):
    """Deterministic init matching the torch module's shapes."""
    ks = jax.random.split(key, 6)

    def linear(kw, kb, fan_in, fan_out):
        # torch default init: U(-1/sqrt(fan_in), 1/sqrt(fan_in))
        bound = 1.0 / jnp.sqrt(jnp.float32(fan_in))
        w = jax.random.uniform(kw, (fan_out, fan_in), jnp.float32, -bound, bound)
        b = jax.random.uniform(kb, (fan_out, 1), jnp.float32, -bound, bound)
        return w, b

    w1, b1 = linear(ks[0], ks[1], 1, 32)           # (32,1), (32,1)
    w2, b2 = linear(ks[2], ks[3], 32, 32)          # (32,32), (32,1)
    w3, b3 = linear(ks[4], ks[5], 32, 1)           # (1,32), (1,1)
    return {"w1": w1, "b1": b1, "w2": w2, "b2": b2, "w3": w3, "b3": b3}


def net_forward_ref(x, p):
    """Pure-JAX reference in the standard (batch, feature) layout."""
    h1 = jnp.maximum(x @ p["w1"].T + p["b1"].T, 0.0)
    h2 = jnp.maximum(h1 @ p["w2"].T + p["b2"].T, 0.0)
    return h2 @ p["w3"].T + p["b3"].T


if __name__ == "__main__":
    key = jax.random.PRNGKey(0)
    kx, kp, kx2 = jax.random.split(key, 3)
    params = init_params(kp)

    # Small primary test (single tile, single in-kernel chunk).
    batch = 8
    x = jax.random.normal(kx, (batch, 1), jnp.float32)
    out = jax.block_until_ready(net_forward(x, params))
    ref = net_forward_ref(x, params)
    assert out.shape == (batch, 1)
    assert jnp.allclose(out, ref, atol=1e-4, rtol=1e-4), "mismatch vs reference (small)"

    # Secondary test exercising multiple grid steps, in-kernel chunk loop and
    # lane padding (still tiny data).
    batch2 = 4100
    x2 = jax.random.normal(kx2, (batch2, 1), jnp.float32)
    out2 = jax.block_until_ready(net_forward(x2, params))
    ref2 = net_forward_ref(x2, params)
    assert out2.shape == (batch2, 1)
    assert jnp.allclose(out2, ref2, atol=1e-4, rtol=1e-4), "mismatch vs reference (tiled)"

    print("KERNEL_OK")
</pallas_src>

<mosaic_0001>
module attributes {stable_mosaic.version = 11 : i64} {
  func.func @mlp_kernel(%arg0: i32, %arg1: memref<1x128xf32, #tpu.memory_space<vmem>>, %arg2: memref<32x1xf32, #tpu.memory_space<vmem>>, %arg3: memref<32x1xf32, #tpu.memory_space<vmem>>, %arg4: memref<32x32xf32, #tpu.memory_space<vmem>>, %arg5: memref<32x1xf32, #tpu.memory_space<vmem>>, %arg6: memref<1x32xf32, #tpu.memory_space<vmem>>, %arg7: memref<1x1xf32, #tpu.memory_space<smem>>, %arg8: memref<1x128xf32, #tpu.memory_space<vmem>>) attributes {dimension_semantics = [#tpu.dimension_semantics<parallel>], iteration_bounds = array<i64: 1>, scalar_prefetch = 0 : i64, scratch_operands = 0 : i64, tpu.core_type = #tpu.core_type<tc>, window_params = [{transform_indices = @transform_0, window_bounds = array<i64: 1, 128>}, {pipeline_mode = #tpu.pipeline_mode<synchronous>, transform_indices = @transform_1, window_bounds = array<i64: 32, 1>}, {pipeline_mode = #tpu.pipeline_mode<synchronous>, transform_indices = @transform_2, window_bounds = array<i64: 32, 1>}, {pipeline_mode = #tpu.pipeline_mode<synchronous>, transform_indices = @transform_3, window_bounds = array<i64: 32, 32>}, {pipeline_mode = #tpu.pipeline_mode<synchronous>, transform_indices = @transform_4, window_bounds = array<i64: 32, 1>}, {pipeline_mode = #tpu.pipeline_mode<synchronous>, transform_indices = @transform_5, window_bounds = array<i64: 1, 32>}, {transform_indices = @transform_6, window_bounds = array<i64: 1, 1>}, {transform_indices = @transform_7, window_bounds = array<i64: 1, 128>}]} {
    %c0 = arith.constant 0 : index
    %c0_0 = arith.constant 0 : index
    %0 = vector.load %arg2[%c0, %c0_0] : memref<32x1xf32, #tpu.memory_space<vmem>>, vector<32x1xf32>
    %c0_1 = arith.constant 0 : index
    %c0_2 = arith.constant 0 : index
    %1 = vector.load %arg3[%c0_1, %c0_2] : memref<32x1xf32, #tpu.memory_space<vmem>>, vector<32x1xf32>
    %c0_3 = arith.constant 0 : index
    %c0_4 = arith.constant 0 : index
    %2 = vector.load %arg4[%c0_3, %c0_4] : memref<32x32xf32, #tpu.memory_space<vmem>>, vector<32x32xf32>
    %c0_5 = arith.constant 0 : index
    %c0_6 = arith.constant 0 : index
    %3 = vector.load %arg5[%c0_5, %c0_6] : memref<32x1xf32, #tpu.memory_space<vmem>>, vector<32x1xf32>
    %c0_7 = arith.constant 0 : index
    %c0_8 = arith.constant 0 : index
    %4 = vector.load %arg6[%c0_7, %c0_8] : memref<1x32xf32, #tpu.memory_space<vmem>>, vector<1x32xf32>
    %c0_9 = arith.constant 0 : index
    %c0_10 = arith.constant 0 : index
    %5 = memref.load %arg7[%c0_9, %c0_10] : memref<1x1xf32, #tpu.memory_space<smem>>
    %c0_i32 = arith.constant 0 : i32
    %c128_i32 = arith.constant 128 : i32
    %6 = arith.muli %c0_i32, %c128_i32 : i32
    %7 = tpu.assume_multiple %6, 128 : i32
    %c0_11 = arith.constant 0 : index
    %8 = arith.index_cast %7 : i32 to index
    %9 = vector.load %arg1[%c0_11, %8] : memref<1x128xf32, #tpu.memory_space<vmem>>, vector<1x128xf32>
    %10 = vector.broadcast %0 : vector<32x1xf32> to vector<32x128xf32>
    %11 = vector.broadcast %9 : vector<1x128xf32> to vector<32x128xf32>
    %12 = arith.mulf %10, %11 : vector<32x128xf32>
    %13 = vector.broadcast %1 : vector<32x1xf32> to vector<32x128xf32>
    %14 = arith.addf %12, %13 : vector<32x128xf32>
    %cst = arith.constant 0.000000e+00 : f32
    %15 = vector.broadcast %cst : f32 to vector<32x128xf32>
    %16 = arith.maximumf %14, %15 : vector<32x128xf32>
    %cst_12 = arith.constant dense<0.000000e+00> : vector<32x128xf32>
    %17 = tpu.matmul %2, %16, %cst_12 {dimension_numbers = #tpu.dot_dimension_numbers<[1], [0], [0], [1], [0, 0, 1, 1], [], []>} : vector<32x32xf32>, vector<32x128xf32>, vector<32x128xf32> -> vector<32x128xf32>
    %18 = vector.broadcast %3 : vector<32x1xf32> to vector<32x128xf32>
    %19 = arith.addf %17, %18 : vector<32x128xf32>
    %cst_13 = arith.constant 0.000000e+00 : f32
    %20 = vector.broadcast %cst_13 : f32 to vector<32x128xf32>
    %21 = arith.maximumf %19, %20 : vector<32x128xf32>
    %cst_14 = arith.constant dense<0.000000e+00> : vector<1x128xf32>
    %22 = tpu.matmul %4, %21, %cst_14 {dimension_numbers = #tpu.dot_dimension_numbers<[1], [0], [0], [1], [0, 0, 1, 1], [], []>} : vector<1x32xf32>, vector<32x128xf32>, vector<1x128xf32> -> vector<1x128xf32>
    %23 = vector.broadcast %5 : f32 to vector<1x128xf32>
    %24 = arith.addf %22, %23 : vector<1x128xf32>
    %c0_15 = arith.constant 0 : index
    %25 = arith.index_cast %7 : i32 to index
    %26 = vector.load %arg8[%c0_15, %25] : memref<1x128xf32, #tpu.memory_space<vmem>>, vector<1x128xf32>
    tpu.vector_store %arg8[%c0_15, %25], %24 {strides = array<i32>} : memref<1x128xf32, #tpu.memory_space<vmem>>, vector<1x128xf32>,
    %c1_i32 = arith.constant 1 : i32
    return
  }
  func.func @transform_0(%arg0: i32) -> (i32, i32) {
    %c0_i32 = arith.constant 0 : i32
    %c0_i32_0 = arith.constant 0 : i32
    return %c0_i32, %arg0 : i32, i32
  }
  func.func @transform_1(%arg0: i32) -> (i32, i32) {
    %c0_i32 = arith.constant 0 : i32
    %c0_i32_0 = arith.constant 0 : i32
    %c0_i32_1 = arith.constant 0 : i32
    return %c0_i32, %c0_i32_0 : i32, i32
  }
  func.func @transform_2(%arg0: i32) -> (i32, i32) {
    %c0_i32 = arith.constant 0 : i32
    %c0_i32_0 = arith.constant 0 : i32
    %c0_i32_1 = arith.constant 0 : i32
    return %c0_i32, %c0_i32_0 : i32, i32
  }
  func.func @transform_3(%arg0: i32) -> (i32, i32) {
    %c0_i32 = arith.constant 0 : i32
    %c0_i32_0 = arith.constant 0 : i32
    %c0_i32_1 = arith.constant 0 : i32
    return %c0_i32, %c0_i32_0 : i32, i32
  }
  func.func @transform_4(%arg0: i32) -> (i32, i32) {
    %c0_i32 = arith.constant 0 : i32
    %c0_i32_0 = arith.constant 0 : i32
    %c0_i32_1 = arith.constant 0 : i32
    return %c0_i32, %c0_i32_0 : i32, i32
  }
  func.func @transform_5(%arg0: i32) -> (i32, i32) {
    %c0_i32 = arith.constant 0 : i32
    %c0_i32_0 = arith.constant 0 : i32
    %c0_i32_1 = arith.constant 0 : i32
    return %c0_i32, %c0_i32_0 : i32, i32
  }
  func.func @transform_6(%arg0: i32) -> (i32, i32) {
    %c0_i32 = arith.constant 0 : i32
    %c0_i32_0 = arith.constant 0 : i32
    %c0_i32_1 = arith.constant 0 : i32
    return %c0_i32, %c0_i32_0 : i32, i32
  }
  func.func @transform_7(%arg0: i32) -> (i32, i32) {
    %c0_i32 = arith.constant 0 : i32
    %c0_i32_0 = arith.constant 0 : i32
    return %c0_i32, %arg0 : i32, i32
  }
}

</mosaic_0001>

<bundles_post_ra>
// kernel: tpu_custom_call.1
= control target key start
LH: loop header
LB: loop body
LE: loop exit
PB: predicated region body
PF: predicated region fallthrough
CT: control target
= control target key end

     0   :  { %v405_v2 = vmov 0   ;;  %s524_s0 = inlined_call_operand.vmem [shape: f32[1,128], index: 0, kind: input, shape index: {}]   ;;  %s525_s1 = inlined_call_operand.vmem [shape: f32[32,1], index: 1, kind: input, shape index: {}]   ;;  %s526_s2 = inlined_call_operand.vmem [shape: f32[32,1], index: 2, kind: input, shape index: {}]   ;;  %s527_s3 = inlined_call_operand.vmem [shape: f32[32,32], index: 3, kind: input, shape index: {}]   ;;  %s528_s4 = inlined_call_operand.vmem [shape: f32[32,1], index: 4, kind: input, shape index: {}]   ;;  %s529_s5 = inlined_call_operand.vmem [shape: f32[1,32], index: 5, kind: input, shape index: {}]   ;;  %s530_s6 = inlined_call_operand.<no memory space> [shape: f32[1,1], index: 6, kind: input, shape index: {}]   ;;  %s531_s7 = inlined_call_operand.hbm [shape: f32[1,128], index: 7, kind: output, shape index: {}]  }
   0x1   :  { %v32_v0 = vld [vmem:[%s526_s2] sm:$0xff]  ;;  %380 = vset.pattern.permute.xlu1 %v405_v2  ;;  %379 = vset.pattern.permute.xlu0 %v405_v2  ;;  %v33_v3 = vld [vmem:[%s526_s2 + $0x8] sm:$0xff] }
   0x2   :  { %v28_v1 = vld [vmem:[%s525_s1] sm:$0xff]  ;;  %79 = vperm.xlu1 %380, %v32_v0   ;;  %v29_v4 = vld [vmem:[%s525_s1 + $0x8] sm:$0xff] }
   0x3   :  { %49 = vperm.xlu0 %379, %v28_v1  }
   0x4   :  { %13 = vsyncpa [#allocation4], 0  ;;  %v31_v5 = vld [vmem:[%s525_s1 + $0x18] sm:$0xff]  ;;  %v30_v6 = vld [vmem:[%s525_s1 + $0x10] sm:$0xff]  ;;  %vm125_vm0 = vcmask 261120   ;;  %v406_v40 = vmov 0.0|0.0   ;;  %v227_v61 = vstv %s530_s6 }
   0x5   :  { %v35_v7 = vld [vmem:[%s526_s2 + $0x18] sm:$0xff]  ;;  %v34_v8 = vld [vmem:[%s526_s2 + $0x10] sm:$0xff]  ;;  %v41_v9 = vld [vmem:[%s528_s4 + $0x8] sm:$0xff]  ;;  %368 = vmatprep.subr.bf16.mxu1 %v406_v40  ;;  %vm407_vm1 = vmmov 0   ;;  %v408_v41 = vmov 0.0   ;;  %s409_s11 = smov [#allocation3]  }
   0x6   :  { %84 = vperm.xlu1 %380, %v33_v3   ;;  %v40_v10 = vld [vmem:[%s528_s4] sm:$0xff]  ;;  %v43_v11 = vld [vmem:[%s528_s4 + $0x18] sm:$0xff]  ;;  %v42_v12 = vld [vmem:[%s528_s4 + $0x10] sm:$0xff]  ;;  %357 = vmatprep.mubr.msk.f32.mxu1 %vm407_vm1, %v408_v41  ;;  %s308_s12 = sshll.u32 %s409_s11, 4  ;;  %s309_s12 = int_to_ptr.vmem [resolvable:$true] %s308_s12 }
   0x7   :  { %54 = vperm.xlu0 %379, %v29_v4   ;;  %v36_v13 = vld [vmem:[%s527_s3] sm:$0xff]  ;;  %v37_v37 = vld [vmem:[%s527_s3 + $0x8] sm:$0xff]  ;;  %v38_v38 = vld [vmem:[%s527_s3 + $0x10] sm:$0xff]  ;;  %s381_s13 = scalar_lea.vmem %s309_s12, 16  ;;  %s385_s14 = scalar_lea.vmem %s309_s12, 32 }
   0x8   :  { %343 = vmatprep.mubr.msk.f32.mxu0 %vm125_vm0, %v36_v13  ;;  %v316_v14 = vld [vmem:[%s524_s0] ss:$0 sm:$0xff]  ;;  %v39_v39 = vld [vmem:[%s527_s3 + $0x18] sm:$0xff]  ;;  %p382_p0 = scmp.ne.s32.totalorder %s309_s12, %s381_s13  ;;  %p386_p1 = scmp.lt.s32.totalorder %s309_s12, %s309_s12 }
   0x9   :  { %v44_v60 = vld [vmem:[%s529_s5] sm:$0x1]  ;;  %p387_p2 = scmp.lt.s32.totalorder %s385_s14, %s381_s13 }
   0xa   :  { %64 = vperm.xlu1 %380, %v31_v5  }
   0xb   :  { %59 = vperm.xlu0 %379, %v30_v6   ;;  %p388_p3 = por %p387_p2, %p386_p1 }
   0xd   :  { %p389_p4 = pnand %p388_p3, %p382_p0 }
   0xe   :  { %94 = vperm.xlu1 %380, %v35_v7  }
   0xf   :  { %89 = vperm.xlu0 %379, %v34_v8  }
  0x12   :  { %112 = vperm.xlu1 %380, %v41_v9  }
  0x13   :  { %107 = vperm.xlu0 %379, %v40_v10  }
  0x16   :  { %122 = vperm.xlu1 %380, %v43_v11  }
  0x17   :  { %117 = vperm.xlu0 %379, %v42_v12  }
  0x81   :  { %v80_v15 = vpop.permute.xlu1 %79 }
  0x82   :  { %v50_v16 = vpop.permute.xlu0 %49 }
  0x83   :  { %v73_v17 = vmul.f32 %v316_v14, %v50_v16 }
  0x85   :  { %v85_v18 = vpop.permute.xlu1 %84  ;;  %v97_v20 = vadd.f32 %v80_v15, %v73_v17 }
  0x86   :  { %v55_v19 = vpop.permute.xlu0 %54 }
  0x87   :  { %v74_v21 = vmul.f32 %v316_v14, %v55_v19  ;;  %v101_v25 = vmax.f32 %v97_v20, 0.0 }
  0x89   :  { %v98_v22 = vadd.f32 %v85_v18, %v74_v21  ;;  %v65_v23 = vpop.permute.xlu1 %64 }
  0x8a   :  { %v60_v24 = vpop.permute.xlu0 %59  ;;  %v76_v27 = vmul.f32 %v316_v14, %v65_v23 }
  0x8b   :  { %v102_v26 = vmax.f32 %v98_v22, 0.0  ;;  %v75_v28 = vmul.f32 %v316_v14, %v60_v24 }
  0x8d   :  { %v360_v29 = vpack.c.bf16 %v102_v26, %v101_v25  ;;  %v95_v30 = vpop.permute.xlu1 %94 }
  0x8e   :  { %v90_v31 = vpop.permute.xlu0 %89  ;;  %v100_v32 = vadd.f32 %v95_v30, %v76_v27 }
  0x8f   :  { %v99_v33 = vadd.f32 %v90_v31, %v75_v28  ;;  %361 = vmatprep.subr.bf16.mxu0 %v360_v29 }
  0x90   :  { %363 = vmatpush3.bf16.msra.mxu0 %v360_v29  ;;  %v104_v34 = vmax.f32 %v100_v32, 0.0 }
  0x91   :  { %v103_v35 = vmax.f32 %v99_v33, 0.0  ;;  %v113_v42 = vpop.permute.xlu1 %112 }
  0x92   :  { %v108_v43 = vpop.permute.xlu0 %107 }
  0x93   :  { %v364_v36 = vpack.c.bf16 %v104_v34, %v103_v35 }
  0x95   :  { %365 = vmatprep.subr.bf16.mxu0 %v364_v36  ;;  %v123_v49 = vpop.permute.xlu1 %122 }
  0x96   :  { %367 = vmatpush3.bf16.msra.mxu0 %v364_v36  ;;  %v118_v52 = vpop.permute.xlu0 %117 }
  0x99   :  { %344 = vmatmul.mubr.msk.f32.vlgmr.msra.gmra.mrb[0].mxu0 %vm125_vm0, %v37_v37 }
  0x9a   :  { %346 = vmatprep.mubr.msk.f32.mxu0 %vm125_vm0, %v38_v38 }
  0x9d   :  { %347 = vmatmul.mubr.msk.f32.gmra.mrb[2].mxu0 %vm125_vm0, %v39_v39 }
 0x16c   :  { %v345_v44 = vpop.f32.mrb[0].mxu0 }
 0x16d   :  { %v210_v45 = vadd.f32 %v345_v44, %v113_v42  ;;  %v204_v46 = vpop.f32.mrb[1].mxu0 }
 0x16e   :  { %v205_v47 = vadd.f32 %v204_v46, %v108_v43 }
 0x16f   :  { %v224_v48 = vmax.f32 %v210_v45, 0.0 }
 0x170   :  { %v223_v50 = vmax.f32 %v205_v47, 0.0  ;;  %v348_v51 = vpop.f32.mrb[2].mxu0 }
 0x171   :  { %v220_v53 = vadd.f32 %v348_v51, %v123_v49  ;;  %v214_v54 = vpop.f32.mrb[3].mxu0 }
 0x172   :  { %v215_v55 = vadd.f32 %v214_v54, %v118_v52  ;;  %v369_v56 = vpack.c.bf16 %v224_v48, %v223_v50 }
 0x173   :  { %v226_v57 = vmax.f32 %v220_v53, 0.0 }
 0x174   :  { %v225_v58 = vmax.f32 %v215_v55, 0.0  ;;  %370 = vmatpush3.bf16.msra.mxu1 %v369_v56 }
 0x175   :  { %371 = vmatprep.subr.bf16.mxu1 %v406_v40 }
 0x176   :  { %v372_v59 = vpack.c.bf16 %v226_v57, %v225_v58 }
 0x178   :  { %373 = vmatpush3.bf16.msra.mxu1 %v372_v59 }
 0x17b   :  { %358 = vmatmul.mubr.msk.f32.vlgmr.msra.gmra.mrb[0].mxu1 %vm125_vm0, %v44_v60 }
 0x24e   :  { %v297_v62 = vpop.f32.mrb[0].mxu1 }
 0x24f   :  { %v298_v63 = vadd.f32 %v297_v62, %v227_v61  ;;  %v359_v0 = vpop.f32.mrb[1].mxu1 }
 0x251   :  { %301 = vst [vmem:[#allocation3] sm:$0x1] %v298_v63 }
 0x252   :  { %392 = shalt.err (!%p389_p4)
}
 0x253   :  { %s393_s16 = scalar_lea.hbm %s531_s7, 16 }
 0x254   :  { %p394_p5 = scmp.ne.s32.totalorder %s531_s7, %s393_s16  ;;  %p397_p6 = scmp.lt.u32.totalorder %s393_s16, %s531_s7 }
 0x256   :  { %p399_p7 = pnand %p397_p6, %p394_p5 }
 0x258   :  { %402 = shalt.err (!%p399_p7)
}
 0x259   :  { %311 = dma.vmem_to_hbm [thread:$0]  %s309_s12, 16, %s531_s7, [#allocation4]  }
 0x25a   :  { %403 = dma.done.wait [#allocation4], 16  }
 0x25b   :  { %404 = vsyncadd [#allocation4], 4294967280 }
 0x25c   :  { %315 = vsyncpa [#allocation4], 1 }

</bundles_post_ra>
